<compile_context>
chip_gen: v6e
topology: v6e:2x2x1
jax: 0.10.0
libtpu: 0.0.40
codegen_flags: <defaults>
</compile_context>

<pallas_src>
import jax
import jax.numpy as jnp
from jax.experimental import pallas as pl
from jax.experimental.pallas import tpu as pltpu


def im2text_kernel(x_ref,
                   w1_ref, b1_ref,
                   w2_ref, b2_ref,
                   w3_ref, b3_ref,
                   bn_scale_ref, bn_shift_ref,
                   o_ref):
    # Layer 1: Linear (bf16 x bf16 -> f32 acc) + (Dropout = identity, eval) + ReLU
    h = jnp.dot(x_ref[...], w1_ref[...], preferred_element_type=jnp.float32)
    h = jnp.maximum(h + b1_ref[...], 0.0)
    # Layer 2
    h = jnp.dot(h.astype(jnp.bfloat16), w2_ref[...],
                preferred_element_type=jnp.float32)
    h = jnp.maximum(h + b2_ref[...], 0.0)
    # Layer 3
    h = jnp.dot(h.astype(jnp.bfloat16), w3_ref[...],
                preferred_element_type=jnp.float32)
    h = jnp.maximum(h + b3_ref[...], 0.0)
    # BatchNorm1d (eval): y = h * scale + shift  (scale/shift folded on host)
    o_ref[...] = (h * bn_scale_ref[...] + bn_shift_ref[...]).astype(o_ref.dtype)


def _round_up(n, m):
    return ((n + m - 1) // m) * m


def _choose_tm(batch):
    # Single grid step for small batches; 256-row tiles for large batches.
    return min(256, _round_up(batch, 8))


def _vmem_budget_bytes(tm, embed_dim, middle_dim, out_dim):
    bf16, f32 = 2, 4
    x_tiles = 2 * tm * embed_dim * bf16                   # double-buffered x tile
    o_tiles = 2 * tm * out_dim * f32                      # double-buffered out tile
    weights = 2 * (embed_dim * middle_dim
                   + 2 * middle_dim * middle_dim) * bf16  # resident (budget 2x)
    vectors = 2 * (3 * middle_dim + 2 * out_dim) * f32    # biases + bn scale/shift
    activ = 2 * tm * middle_dim * f32                     # in-flight f32 intermediates
    return x_tiles + o_tiles + weights + vectors + activ


def im2text_forward(x, params):
    """x: (B, embed_dim) f32.  params: dict of weights (see init_params)."""
    B, embed_dim = x.shape
    middle_dim = params["w1"].shape[1]
    out_dim = params["w3"].shape[1]
    # forward() feeds middle_dim features into BatchNorm1d(output_dim); torch
    # would error if they differ, so require it here too.
    assert params["bn_gamma"].shape[0] == out_dim

    # Fold eval-mode BatchNorm1d into per-feature scale/shift (glue, plain JAX).
    eps = 1e-5
    inv_std = 1.0 / jnp.sqrt(params["bn_running_var"] + eps)
    bn_scale = (params["bn_gamma"] * inv_std).reshape(1, -1).astype(jnp.float32)
    bn_shift = (params["bn_beta"] - params["bn_running_mean"]
                * params["bn_gamma"] * inv_std).reshape(1, -1).astype(jnp.float32)

    b1 = params["b1"].reshape(1, -1).astype(jnp.float32)
    b2 = params["b2"].reshape(1, -1).astype(jnp.float32)
    b3 = params["b3"].reshape(1, -1).astype(jnp.float32)

    # bf16 operands for the MXU / halved HBM traffic (f32 accumulation in-kernel).
    w1 = params["w1"].astype(jnp.bfloat16)
    w2 = params["w2"].astype(jnp.bfloat16)
    w3 = params["w3"].astype(jnp.bfloat16)
    x_bf16 = x.astype(jnp.bfloat16)

    # Tile batch; pad to a multiple of tm so no tail rows are dropped.
    tm = _choose_tm(B)
    B_pad = _round_up(B, tm)
    if B_pad != B:
        x_bf16 = jnp.pad(x_bf16, ((0, B_pad - B), (0, 0)))
    grid = (pl.cdiv(B_pad, tm),)

    def resident(shape):
        # Whole-array block, same tile for every grid step (grid-invariant).
        return pl.BlockSpec(shape, lambda i: (0, 0))

    flops = 2 * B_pad * (embed_dim * middle_dim + 2 * middle_dim * middle_dim)
    bytes_accessed = (B_pad * embed_dim * 2 + B_pad * out_dim * 4
                      + (embed_dim * middle_dim + 2 * middle_dim * middle_dim) * 2
                      + (3 * middle_dim + 2 * out_dim) * 4)

    vmem_limit = int(min(
        max(2 * _vmem_budget_bytes(tm, embed_dim, middle_dim, out_dim),
            32 * 1024 * 1024),
        48 * 1024 * 1024))  # leave headroom on v7x's 64 MiB VMEM

    out = pl.pallas_call(
        im2text_kernel,
        out_shape=jax.ShapeDtypeStruct((B_pad, out_dim), jnp.float32),
        grid=grid,
        in_specs=[
            pl.BlockSpec((tm, embed_dim), lambda i: (i, 0)),   # x tile
            resident(w1.shape), resident(b1.shape),
            resident(w2.shape), resident(b2.shape),
            resident(w3.shape), resident(b3.shape),
            resident(bn_scale.shape), resident(bn_shift.shape),
        ],
        out_specs=pl.BlockSpec((tm, out_dim), lambda i: (i, 0)),
        compiler_params=pltpu.CompilerParams(
            dimension_semantics=("parallel",),
            vmem_limit_bytes=vmem_limit),
        cost_estimate=pl.CostEstimate(
            flops=flops, transcendentals=0, bytes_accessed=bytes_accessed),
    )(x_bf16, w1, b1, w2, b2, w3, b3, bn_scale, bn_shift)

    return out[:B] if B_pad != B else out


def init_params(key, embed_dim, middle_dim, output_dim):
    """Deterministic synthetic parameters matching IM2TEXT.__init__ shapes."""
    ks = jax.random.split(key, 8)
    scale = 0.05

    def lin(kw, kb, din, dout):
        w = scale * jax.random.normal(kw, (din, dout), jnp.float32)
        b = scale * jax.random.normal(kb, (dout,), jnp.float32)
        return w, b

    w1, b1 = lin(ks[0], ks[1], embed_dim, middle_dim)
    w2, b2 = lin(ks[2], ks[3], middle_dim, middle_dim)
    w3, b3 = lin(ks[4], ks[5], middle_dim, middle_dim)
    # bottleneck BatchNorm1d(output_dim) -- forward feeds it middle_dim features,
    # which matches because middle_dim == output_dim in the reference defaults.
    gamma = 1.0 + 0.1 * jax.random.normal(ks[6], (output_dim,), jnp.float32)
    beta = 0.1 * jax.random.normal(ks[7], (output_dim,), jnp.float32)
    running_mean = jnp.linspace(-0.1, 0.1, output_dim, dtype=jnp.float32)
    running_var = jnp.linspace(0.5, 1.5, output_dim, dtype=jnp.float32)
    # TODO(synk): self.fc_out (Linear(middle_dim, output_dim)) is unused in
    # forward(), so it is intentionally not instantiated here.
    return dict(w1=w1, b1=b1, w2=w2, b2=b2, w3=w3, b3=b3,
                bn_gamma=gamma, bn_beta=beta,
                bn_running_mean=running_mean, bn_running_var=running_var)


def reference_forward(x, params):
    """Pure-JAX f32 reference for verification."""
    h = x
    for w, b in ((params["w1"], params["b1"]),
                 (params["w2"], params["b2"]),
                 (params["w3"], params["b3"])):
        h = jnp.maximum(h @ w + b, 0.0)
    eps = 1e-5
    inv_std = 1.0 / jnp.sqrt(params["bn_running_var"] + eps)
    return (h - params["bn_running_mean"]) * inv_std * params["bn_gamma"] + params["bn_beta"]


if __name__ == "__main__":
    # Small shapes consistent with the module (x: (batch, embed_dim)).
    B, embed_dim, middle_dim, output_dim = 16, 128, 128, 128

    key = jax.random.PRNGKey(0)
    kx, kp = jax.random.split(key)
    x = jax.random.normal(kx, (B, embed_dim), jnp.float32)
    params = init_params(kp, embed_dim, middle_dim, output_dim)

    out = im2text_forward(x, params)
    out = jax.block_until_ready(out)

    ref = reference_forward(x, params)
    assert out.shape == (B, output_dim)
    # bf16 inputs/weights with f32 accumulation -> slightly looser tolerance
    # than a pure-f32 comparison.
    assert jnp.allclose(out, ref, atol=2e-2, rtol=2e-2), "mismatch vs reference"

    print("KERNEL_OK")
</pallas_src>

<mosaic_0001>
module attributes {stable_mosaic.version = 11 : i64} {
  func.func @im2text_kernel(%arg0: i32, %arg1: memref<16x128xbf16, #tpu.memory_space<vmem>>, %arg2: memref<128x128xbf16, #tpu.memory_space<vmem>>, %arg3: memref<1x128xf32, #tpu.memory_space<vmem>>, %arg4: memref<128x128xbf16, #tpu.memory_space<vmem>>, %arg5: memref<1x128xf32, #tpu.memory_space<vmem>>, %arg6: memref<128x128xbf16, #tpu.memory_space<vmem>>, %arg7: memref<1x128xf32, #tpu.memory_space<vmem>>, %arg8: memref<1x128xf32, #tpu.memory_space<vmem>>, %arg9: memref<1x128xf32, #tpu.memory_space<vmem>>, %arg10: memref<16x128xf32, #tpu.memory_space<vmem>>) attributes {dimension_semantics = [#tpu.dimension_semantics<parallel>], iteration_bounds = array<i64: 1>, scalar_prefetch = 0 : i64, scratch_operands = 0 : i64, tpu.core_type = #tpu.core_type<tc>, window_params = [{transform_indices = @transform_0, window_bounds = array<i64: 16, 128>}, {pipeline_mode = #tpu.pipeline_mode<synchronous>, transform_indices = @transform_1, window_bounds = array<i64: 128, 128>}, {pipeline_mode = #tpu.pipeline_mode<synchronous>, transform_indices = @transform_2, window_bounds = array<i64: 1, 128>}, {pipeline_mode = #tpu.pipeline_mode<synchronous>, transform_indices = @transform_3, window_bounds = array<i64: 128, 128>}, {pipeline_mode = #tpu.pipeline_mode<synchronous>, transform_indices = @transform_4, window_bounds = array<i64: 1, 128>}, {pipeline_mode = #tpu.pipeline_mode<synchronous>, transform_indices = @transform_5, window_bounds = array<i64: 128, 128>}, {pipeline_mode = #tpu.pipeline_mode<synchronous>, transform_indices = @transform_6, window_bounds = array<i64: 1, 128>}, {pipeline_mode = #tpu.pipeline_mode<synchronous>, transform_indices = @transform_7, window_bounds = array<i64: 1, 128>}, {pipeline_mode = #tpu.pipeline_mode<synchronous>, transform_indices = @transform_8, window_bounds = array<i64: 1, 128>}, {transform_indices = @transform_9, window_bounds = array<i64: 16, 128>}]} {
    %c0 = arith.constant 0 : index
    %c0_0 = arith.constant 0 : index
    %0 = vector.load %arg1[%c0, %c0_0] : memref<16x128xbf16, #tpu.memory_space<vmem>>, vector<16x128xbf16>
    %c0_1 = arith.constant 0 : index
    %c0_2 = arith.constant 0 : index
    %1 = vector.load %arg2[%c0_1, %c0_2] : memref<128x128xbf16, #tpu.memory_space<vmem>>, vector<128x128xbf16>
    %cst = arith.constant dense<0.000000e+00> : vector<16x128xf32>
    %2 = tpu.matmul %0, %1, %cst {dimension_numbers = #tpu.dot_dimension_numbers<[1], [0], [0], [1], [0, 0, 1, 1], [], []>} : vector<16x128xbf16>, vector<128x128xbf16>, vector<16x128xf32> -> vector<16x128xf32>
    %c0_3 = arith.constant 0 : index
    %c0_4 = arith.constant 0 : index
    %3 = vector.load %arg3[%c0_3, %c0_4] : memref<1x128xf32, #tpu.memory_space<vmem>>, vector<1x128xf32>
    %4 = vector.broadcast %3 : vector<1x128xf32> to vector<16x128xf32>
    %5 = arith.addf %2, %4 : vector<16x128xf32>
    %cst_5 = arith.constant 0.000000e+00 : f32
    %6 = vector.broadcast %cst_5 : f32 to vector<16x128xf32>
    %7 = arith.maximumf %5, %6 : vector<16x128xf32>
    %8 = arith.truncf %7 : vector<16x128xf32> to vector<16x128xbf16>
    %c0_6 = arith.constant 0 : index
    %c0_7 = arith.constant 0 : index
    %9 = vector.load %arg4[%c0_6, %c0_7] : memref<128x128xbf16, #tpu.memory_space<vmem>>, vector<128x128xbf16>
    %cst_8 = arith.constant dense<0.000000e+00> : vector<16x128xf32>
    %10 = tpu.matmul %8, %9, %cst_8 {dimension_numbers = #tpu.dot_dimension_numbers<[1], [0], [0], [1], [0, 0, 1, 1], [], []>} : vector<16x128xbf16>, vector<128x128xbf16>, vector<16x128xf32> -> vector<16x128xf32>
    %c0_9 = arith.constant 0 : index
    %c0_10 = arith.constant 0 : index
    %11 = vector.load %arg5[%c0_9, %c0_10] : memref<1x128xf32, #tpu.memory_space<vmem>>, vector<1x128xf32>
    %12 = vector.broadcast %11 : vector<1x128xf32> to vector<16x128xf32>
    %13 = arith.addf %10, %12 : vector<16x128xf32>
    %cst_11 = arith.constant 0.000000e+00 : f32
    %14 = vector.broadcast %cst_11 : f32 to vector<16x128xf32>
    %15 = arith.maximumf %13, %14 : vector<16x128xf32>
    %16 = arith.truncf %15 : vector<16x128xf32> to vector<16x128xbf16>
    %c0_12 = arith.constant 0 : index
    %c0_13 = arith.constant 0 : index
    %17 = vector.load %arg6[%c0_12, %c0_13] : memref<128x128xbf16, #tpu.memory_space<vmem>>, vector<128x128xbf16>
    %cst_14 = arith.constant dense<0.000000e+00> : vector<16x128xf32>
    %18 = tpu.matmul %16, %17, %cst_14 {dimension_numbers = #tpu.dot_dimension_numbers<[1], [0], [0], [1], [0, 0, 1, 1], [], []>} : vector<16x128xbf16>, vector<128x128xbf16>, vector<16x128xf32> -> vector<16x128xf32>
    %c0_15 = arith.constant 0 : index
    %c0_16 = arith.constant 0 : index
    %19 = vector.load %arg7[%c0_15, %c0_16] : memref<1x128xf32, #tpu.memory_space<vmem>>, vector<1x128xf32>
    %20 = vector.broadcast %19 : vector<1x128xf32> to vector<16x128xf32>
    %21 = arith.addf %18, %20 : vector<16x128xf32>
    %cst_17 = arith.constant 0.000000e+00 : f32
    %22 = vector.broadcast %cst_17 : f32 to vector<16x128xf32>
    %23 = arith.maximumf %21, %22 : vector<16x128xf32>
    %c0_18 = arith.constant 0 : index
    %c0_19 = arith.constant 0 : index
    %24 = vector.load %arg8[%c0_18, %c0_19] : memref<1x128xf32, #tpu.memory_space<vmem>>, vector<1x128xf32>
    %25 = vector.broadcast %24 : vector<1x128xf32> to vector<16x128xf32>
    %26 = arith.mulf %23, %25 : vector<16x128xf32>
    %c0_20 = arith.constant 0 : index
    %c0_21 = arith.constant 0 : index
    %27 = vector.load %arg9[%c0_20, %c0_21] : memref<1x128xf32, #tpu.memory_space<vmem>>, vector<1x128xf32>
    %28 = vector.broadcast %27 : vector<1x128xf32> to vector<16x128xf32>
    %29 = arith.addf %26, %28 : vector<16x128xf32>
    %c0_22 = arith.constant 0 : index
    %c0_23 = arith.constant 0 : index
    %30 = vector.load %arg10[%c0_22, %c0_23] : memref<16x128xf32, #tpu.memory_space<vmem>>, vector<16x128xf32>
    tpu.vector_store %arg10[%c0_22, %c0_23], %29 {strides = array<i32>} : memref<16x128xf32, #tpu.memory_space<vmem>>, vector<16x128xf32>,
    return
  }
  func.func @transform_0(%arg0: i32) -> (i32, i32) {
    %c0_i32 = arith.constant 0 : i32
    %c0_i32_0 = arith.constant 0 : i32
    return %arg0, %c0_i32 : i32, i32
  }
  func.func @transform_1(%arg0: i32) -> (i32, i32) {
    %c0_i32 = arith.constant 0 : i32
    %c0_i32_0 = arith.constant 0 : i32
    %c0_i32_1 = arith.constant 0 : i32
    return %c0_i32, %c0_i32_0 : i32, i32
  }
  func.func @transform_2(%arg0: i32) -> (i32, i32) {
    %c0_i32 = arith.constant 0 : i32
    %c0_i32_0 = arith.constant 0 : i32
    %c0_i32_1 = arith.constant 0 : i32
    return %c0_i32, %c0_i32_0 : i32, i32
  }
  func.func @transform_3(%arg0: i32) -> (i32, i32) {
    %c0_i32 = arith.constant 0 : i32
    %c0_i32_0 = arith.constant 0 : i32
    %c0_i32_1 = arith.constant 0 : i32
    return %c0_i32, %c0_i32_0 : i32, i32
  }
  func.func @transform_4(%arg0: i32) -> (i32, i32) {
    %c0_i32 = arith.constant 0 : i32
    %c0_i32_0 = arith.constant 0 : i32
    %c0_i32_1 = arith.constant 0 : i32
    return %c0_i32, %c0_i32_0 : i32, i32
  }
  func.func @transform_5(%arg0: i32) -> (i32, i32) {
    %c0_i32 = arith.constant 0 : i32
    %c0_i32_0 = arith.constant 0 : i32
    %c0_i32_1 = arith.constant 0 : i32
    return %c0_i32, %c0_i32_0 : i32, i32
  }
  func.func @transform_6(%arg0: i32) -> (i32, i32) {
    %c0_i32 = arith.constant 0 : i32
    %c0_i32_0 = arith.constant 0 : i32
    %c0_i32_1 = arith.constant 0 : i32
    return %c0_i32, %c0_i32_0 : i32, i32
  }
  func.func @transform_7(%arg0: i32) -> (i32, i32) {
    %c0_i32 = arith.constant 0 : i32
    %c0_i32_0 = arith.constant 0 : i32
    %c0_i32_1 = arith.constant 0 : i32
    return %c0_i32, %c0_i32_0 : i32, i32
  }
  func.func @transform_8(%arg0: i32) -> (i32, i32) {
    %c0_i32 = arith.constant 0 : i32
    %c0_i32_0 = arith.constant 0 : i32
    %c0_i32_1 = arith.constant 0 : i32
    return %c0_i32, %c0_i32_0 : i32, i32
  }
  func.func @transform_9(%arg0: i32) -> (i32, i32) {
    %c0_i32 = arith.constant 0 : i32
    %c0_i32_0 = arith.constant 0 : i32
    return %arg0, %c0_i32 : i32, i32
  }
}

</mosaic_0001>

<bundles_post_ra>
// kernel: tpu_custom_call.1
= control target key start
LH: loop header
LB: loop body
LE: loop exit
PB: predicated region body
PF: predicated region fallthrough
CT: control target
= control target key end

     0   :  { %14 = vsyncpa [#allocation3], 0  ;;  %s874_s0 = inlined_call_operand.hbm [shape: bf16[16,128], index: 0, kind: input, shape index: {}]   ;;  %s875_s1 = inlined_call_operand.hbm [shape: bf16[128,128], index: 1, kind: input, shape index: {}]   ;;  %s876_s2 = inlined_call_operand.vmem [shape: f32[1,128], index: 2, kind: input, shape index: {}]   ;;  %s877_s3 = inlined_call_operand.hbm [shape: bf16[128,128], index: 3, kind: input, shape index: {}]   ;;  %s878_s4 = inlined_call_operand.vmem [shape: f32[1,128], index: 4, kind: input, shape index: {}]   ;;  %s879_s5 = inlined_call_operand.hbm [shape: bf16[128,128], index: 5, kind: input, shape index: {}]   ;;  %s880_s6 = inlined_call_operand.vmem [shape: f32[1,128], index: 6, kind: input, shape index: {}]   ;;  %s881_s7 = inlined_call_operand.vmem [shape: f32[1,128], index: 7, kind: input, shape index: {}]   ;;  %s882_s8 = inlined_call_operand.vmem [shape: f32[1,128], index: 8, kind: input, shape index: {}]   ;;  %s883_s9 = inlined_call_operand.hbm [shape: f32[16,128], index: 9, kind: output, shape index: {}]  }
   0x1   :  { %15 = vsyncpa [#allocation6], 0 }
   0x2   :  { %16 = vsyncpa [#allocation9], 0 }
   0x3   :  { %17 = vsyncpa [#allocation4], 0  ;;  %s741_s30 = smov [#allocation5]   ;;  %s742_s11 = smov [#allocation2]  }
   0x4   :  { %s35_s10 = sshll.u32 %s741_s30, 4  ;;  %s23_s12 = sshll.u32 %s742_s11, 4  ;;  %s36_s10 = int_to_ptr.vmem [resolvable:$true] %s35_s10  ;;  %s24_s12 = int_to_ptr.vmem [resolvable:$true] %s23_s12 }
   0x5   :  { %s641_s13 = scalar_lea.vmem %s36_s10, 1024  ;;  %p646_p1 = scmp.lt.s32.totalorder %s36_s10, %s36_s10 }
   0x6   :  { %p642_p0 = scmp.ne.s32.totalorder %s36_s10, %s641_s13  ;;  %p647_p2 = scmp.lt.s32.totalorder %s641_s13, %s641_s13 }
   0x8   :  { %p648_p3 = por %p647_p2, %p646_p1 }
   0xa   :  { %p649_p4 = pnand %p648_p3, %p642_p0 }
   0xc   :  { %652 = shalt.err (!%p649_p4)
}
   0xd   :  { %s743_s14 = smov 64   ;;  %s744_s15 = smov 4  }
   0xe   :  { %41 = dma.hbm_to_vmem [thread:$0]  %s875_s1, 1024, %s36_s10, [#allocation6], %s743_s14, %s743_s14, %s744_s15  }
   0xf   :  { %s661_s18 = scalar_lea.vmem %s24_s12, 128  ;;  %p666_p6 = scmp.lt.s32.totalorder %s24_s12, %s24_s12 }
  0x10   :  { %p662_p5 = scmp.ne.s32.totalorder %s24_s12, %s661_s18  ;;  %p667_p7 = scmp.lt.s32.totalorder %s661_s18, %s661_s18 }
  0x12   :  { %p668_p8 = por %p667_p7, %p666_p6 }
  0x14   :  { %p669_p9 = pnand %p668_p8, %p662_p5 }
  0x16   :  { %672 = shalt.err (!%p669_p9)
}
  0x17   :  { %29 = dma.hbm_to_vmem [thread:$0]  %s874_s0, 128, %s24_s12, [#allocation3], %s743_s14, %s743_s14, %s744_s15  }
  0x18   :  { %s745_s21 = smov [#allocation7]   ;;  %s746_s23 = smov [#allocation8]  }
  0x19   :  { %s49_s22 = sshll.u32 %s745_s21, 4  ;;  %s63_s24 = sshll.u32 %s746_s23, 4  ;;  %s50_s22 = int_to_ptr.vmem [resolvable:$true] %s49_s22  ;;  %s64_s24 = int_to_ptr.vmem [resolvable:$true] %s63_s24 }
  0x1a   :  { %s681_s1 = scalar_lea.vmem %s50_s22, 1024  ;;  %p686_p11 = scmp.lt.s32.totalorder %s50_s22, %s50_s22 }
  0x1b   :  { %p682_p10 = scmp.ne.s32.totalorder %s50_s22, %s681_s1  ;;  %p687_p12 = scmp.lt.s32.totalorder %s681_s1, %s681_s1 }
  0x1d   :  { %p688_p13 = por %p687_p12, %p686_p11 }
  0x1f   :  { %p689_p0 = pnand %p688_p13, %p682_p10 }
  0x21   :  { %692 = shalt.err (!%p689_p0)
}
  0x22   :  { %55 = dma.hbm_to_vmem [thread:$0]  %s877_s3, 1024, %s50_s22, [#allocation6], %s743_s14, %s743_s14, %s744_s15  }
  0x23   :  { %s701_s0 = scalar_lea.vmem %s64_s24, 1024  ;;  %p706_p2 = scmp.lt.s32.totalorder %s64_s24, %s64_s24 }
  0x24   :  { %p702_p1 = scmp.ne.s32.totalorder %s64_s24, %s701_s0  ;;  %p707_p3 = scmp.lt.s32.totalorder %s701_s0, %s701_s0 }
  0x26   :  { %p708_p4 = por %p707_p3, %p706_p2 }
  0x28   :  { %p709_p5 = pnand %p708_p4, %p702_p1 }
  0x2a   :  { %712 = shalt.err (!%p709_p5)
}
  0x2b   :  { %69 = dma.hbm_to_vmem [thread:$0]  %s879_s5, 1024, %s64_s24, [#allocation9], %s743_s14, %s743_s14, %s744_s15  }
  0x2c   :  { %733 = dma.done.wait [#allocation3], 128  }
  0x2d   :  { %734 = vsyncadd [#allocation3], 4294967168 }
  0x2e   :  { %735 = dma.done.wait [#allocation6], 2048  }
  0x2f   :  { %736 = vsyncadd [#allocation6], 4294965248 }
  0x30   :  { %737 = dma.done.wait [#allocation9], 1024  }
  0x31   :  { %738 = vsyncadd [#allocation9], 4294966272  ;;  %v747_v0 = vmov 0.0   ;;  %vm748_vm0 = vmmov 0   ;;  %v608_v1 = vld [vmem:[#allocation5 + $0x38] sm:$0xff]   ;;  %v609_v2 = vld [vmem:[#allocation5 + $0x30] sm:$0xff]  }
  0x32   :  { %537 = vmatprep.subr.bf16.mxu0 %v747_v0  ;;  %553 = vmatprep.mubr.msk.bf16.mxu0 %vm748_vm0, %v747_v0  ;;  %v610_v3 = vld [vmem:[#allocation5 + $0x28] sm:$0xff]   ;;  %v617_v4 = vld [vmem:[#allocation7 + $0x38] sm:$0xff]   ;;  %v611_v5 = vld [vmem:[#allocation5 + $0x20] sm:$0xff]   ;;  %s749_s14 = smov [#allocation10]  }
  0x33   :  { %557 = vmatprep.subr.bf16.mxu1 %v747_v0  ;;  %573 = vmatprep.mubr.msk.bf16.mxu1 %vm748_vm0, %v747_v0  ;;  %v618_v6 = vld [vmem:[#allocation7 + $0x30] sm:$0xff]   ;;  %v612_v7 = vld [vmem:[#allocation5 + $0x18] sm:$0xff]   ;;  %v619_v8 = vld [vmem:[#allocation7 + $0x28] sm:$0xff]  }
  0x34   :  { %538 = vmatpush3.bf16.msra.mxu0 %v608_v1  ;;  %558 = vmatpush3.bf16.msra.mxu1 %v617_v4  ;;  %v613_v9 = vld [vmem:[#allocation5 + $0x10] sm:$0xff]   ;;  %v620_v10 = vld [vmem:[#allocation7 + $0x20] sm:$0xff]   ;;  %v614_v11 = vld [vmem:[#allocation5 + $0x8] sm:$0xff]  }
  0x35   :  { %539 = vmatprep.subr.bf16.mxu0 %v747_v0  ;;  %559 = vmatprep.subr.bf16.mxu1 %v747_v0  ;;  %v621_v12 = vld [vmem:[#allocation7 + $0x18] sm:$0xff]   ;;  %v615_v13 = vld [vmem:[#allocation5] sm:$0xff]   ;;  %v622_v15 = vld [vmem:[#allocation7 + $0x10] sm:$0xff]  }
  0x36   :  { %v616_v14 = vld [vmem:[#allocation2] sm:$0xff]   ;;  %v623_v16 = vld [vmem:[#allocation7 + $0x8] sm:$0xff]   ;;  %v624_v17 = vld [vmem:[#allocation7] sm:$0xff]  }
  0x37   :  { %v625_v18 = vld [vmem:[#allocation8 + $0x38] sm:$0xff]   ;;  %v626_v19 = vld [vmem:[#allocation8 + $0x30] sm:$0xff]   ;;  %v627_v20 = vld [vmem:[#allocation8 + $0x28] sm:$0xff]  }
  0x38   :  { %540 = vmatpush3.bf16.msra.mxu0 %v609_v2  ;;  %560 = vmatpush3.bf16.msra.mxu1 %v618_v6  ;;  %v628_v21 = vld [vmem:[#allocation8 + $0x20] sm:$0xff]   ;;  %v629_v22 = vld [vmem:[#allocation8 + $0x18] sm:$0xff]   ;;  %v630_v33 = vld [vmem:[#allocation8 + $0x10] sm:$0xff]  }
  0x39   :  { %541 = vmatprep.subr.bf16.mxu0 %v747_v0  ;;  %561 = vmatprep.subr.bf16.mxu1 %v747_v0  ;;  %v480_v23 = vld [vmem:[%s876_s2] ss:$0 sm:$0xff]  ;;  %v631_v34 = vld [vmem:[#allocation8 + $0x8] sm:$0xff]   ;;  %v632_v35 = vld [vmem:[#allocation8] sm:$0xff]  }
  0x3a   :  { %v490_v36 = vld [vmem:[%s878_s4] ss:$0 sm:$0xff] }
  0x3b   :  { %v499_v46 = vld [vmem:[%s880_s6] ss:$0 sm:$0xff]  ;;  %s466_s6 = sshll.u32 %s749_s14, 4  ;;  %s467_s6 = int_to_ptr.vmem [resolvable:$true] %s466_s6 }
  0x3c   :  { %542 = vmatpush3.bf16.msra.mxu0 %v610_v3  ;;  %562 = vmatpush3.bf16.msra.mxu1 %v619_v8  ;;  %v508_v49 = vld [vmem:[%s881_s7] ss:$0 sm:$0xff]  ;;  %s713_s7 = scalar_lea.vmem %s467_s6, 256  ;;  %p718_p7 = scmp.lt.s32.totalorder %s467_s6, %s467_s6 }
  0x3d   :  { %543 = vmatprep.subr.bf16.mxu0 %v747_v0  ;;  %563 = vmatprep.subr.bf16.mxu1 %v747_v0  ;;  %v509_v52 = vld [vmem:[%s882_s8] ss:$0 sm:$0xff]  ;;  %p714_p6 = scmp.ne.s32.totalorder %s467_s6, %s713_s7  ;;  %p719_p8 = scmp.lt.s32.totalorder %s713_s7, %s713_s7 }
  0x3f   :  { %p720_p9 = por %p719_p8, %p718_p7 }
  0x40   :  { %544 = vmatpush3.bf16.msra.mxu0 %v611_v5  ;;  %564 = vmatpush3.bf16.msra.mxu1 %v620_v10 }
  0x41   :  { %545 = vmatprep.subr.bf16.mxu0 %v747_v0  ;;  %565 = vmatprep.subr.bf16.mxu1 %v747_v0  ;;  %p721_p10 = pnand %p720_p9, %p714_p6 }
  0x44   :  { %546 = vmatpush3.bf16.msra.mxu0 %v612_v7  ;;  %566 = vmatpush3.bf16.msra.mxu1 %v621_v12 }
  0x45   :  { %547 = vmatprep.subr.bf16.mxu0 %v747_v0  ;;  %567 = vmatprep.subr.bf16.mxu1 %v747_v0 }
  0x48   :  { %548 = vmatpush3.bf16.msra.mxu0 %v613_v9  ;;  %568 = vmatpush3.bf16.msra.mxu1 %v622_v15 }
  0x49   :  { %549 = vmatprep.subr.bf16.mxu0 %v747_v0  ;;  %569 = vmatprep.subr.bf16.mxu1 %v747_v0 }
  0x4c   :  { %550 = vmatpush3.bf16.msra.mxu0 %v614_v11  ;;  %570 = vmatpush3.bf16.msra.mxu1 %v623_v16 }
  0x4d   :  { %551 = vmatprep.subr.bf16.mxu0 %v747_v0  ;;  %571 = vmatprep.subr.bf16.mxu1 %v747_v0 }
  0x50   :  { %552 = vmatpush3.bf16.msra.mxu0 %v615_v13  ;;  %572 = vmatpush3.bf16.msra.mxu1 %v624_v17 }
  0x51   :  { %577 = vmatprep.subr.bf16.mxu0 %v747_v0 }
  0x53   :  { %554 = vmatmul.mubr.bf16.vlgmr.msra.gmra.mxu0 %v616_v14 }
  0x54   :  { %593 = vmatprep.mubr.msk.bf16.mxu0 %vm748_vm0, %v747_v0  ;;  %578 = vmatpush3.bf16.msra.mxu0 %v625_v18 }
  0x55   :  { %579 = vmatprep.subr.bf16.mxu0 %v747_v0 }
  0x58   :  { %580 = vmatpush3.bf16.msra.mxu0 %v626_v19 }
  0x59   :  { %581 = vmatprep.subr.bf16.mxu0 %v747_v0 }
  0x5c   :  { %582 = vmatpush3.bf16.msra.mxu0 %v627_v20 }
  0x5d   :  { %583 = vmatprep.subr.bf16.mxu0 %v747_v0 }
  0x60   :  { %584 = vmatpush3.bf16.msra.mxu0 %v628_v21 }
  0x61   :  { %585 = vmatprep.subr.bf16.mxu0 %v747_v0 }
  0x64   :  { %586 = vmatpush3.bf16.msra.mxu0 %v629_v22 }
  0x65   :  { %587 = vmatprep.subr.bf16.mxu0 %v747_v0 }
  0x68   :  { %588 = vmatpush3.bf16.msra.mxu0 %v630_v33 }
  0x69   :  { %589 = vmatprep.subr.bf16.mxu0 %v747_v0 }
  0x6c   :  { %590 = vmatpush3.bf16.msra.mxu0 %v631_v34 }
  0x6d   :  { %591 = vmatprep.subr.bf16.mxu0 %v747_v0 }
  0x70   :  { %592 = vmatpush3.bf16.msra.mxu0 %v632_v35 }
 0x113   :  { %v202_v24 = vpop.f32.mrf.mxu0 }
 0x114   :  { %v203_v26 = vadd.f32 %v480_v23, %v202_v24 }
 0x115   :  { %v555_v25 = vpop.f32.mrf.mxu0 }
 0x116   :  { %v209_v30 = vmax.f32 %v203_v26, 0.0 }
 0x117   :  { %v205_v27 = vpop.f32.mrf.mxu0 }
 0x118   :  { %v206_v28 = vadd.f32 %v480_v23, %v205_v27 }
 0x119   :  { %v556_v29 = vpop.f32.mrf.mxu0 }
 0x11a   :  { %v210_v31 = vmax.f32 %v206_v28, 0.0 }
 0x11c   :  { %v211_v32 = vpack.c.bf16 %v210_v31, %v209_v30 }
 0x11e   :  { %574 = vmatmul.mubr.bf16.vlgmr.msra.gmra.mxu1 %v211_v32 }
 0x1de   :  { %v317_v37 = vpop.f32.mrf.mxu1 }
 0x1df   :  { %v318_v39 = vadd.f32 %v490_v36, %v317_v37 }
 0x1e0   :  { %v575_v38 = vpop.f32.mrf.mxu1 }
 0x1e1   :  { %v324_v43 = vmax.f32 %v318_v39, 0.0 }
 0x1e2   :  { %v320_v40 = vpop.f32.mrf.mxu1 }
 0x1e3   :  { %v321_v41 = vadd.f32 %v490_v36, %v320_v40 }
 0x1e4   :  { %v576_v42 = vpop.f32.mrf.mxu1 }
 0x1e5   :  { %v325_v44 = vmax.f32 %v321_v41, 0.0 }
 0x1e7   :  { %v326_v45 = vpack.c.bf16 %v325_v44, %v324_v43 }
 0x1e9   :  { %594 = vmatmul.mubr.bf16.vlgmr.msra.gmra.mxu0 %v326_v45 }
 0x2a9   :  { %v432_v47 = vpop.f32.mrf.mxu0 }
 0x2aa   :  { %v433_v48 = vadd.f32 %v499_v46, %v432_v47 }
 0x2ab   :  { %v595_v50 = vpop.f32.mrf.mxu0 }
 0x2ac   :  { %v439_v51 = vmax.f32 %v433_v48, 0.0 }
 0x2ad   :  { %v435_v53 = vpop.f32.mrf.mxu0 }
 0x2ae   :  { %v448_v54 = vmul.f32 %v508_v49, %v439_v51  ;;  %v436_v55 = vadd.f32 %v499_v46, %v435_v53 }
 0x2af   :  { %v596_v56 = vpop.f32.mrf.mxu0 }
 0x2b0   :  { %v457_v57 = vadd.f32 %v509_v52, %v448_v54  ;;  %v440_v58 = vmax.f32 %v436_v55, 0.0 }
 0x2b2   :  { %459 = vst [vmem:[#allocation10] sm:$0xff] %v457_v57  ;;  %v449_v59 = vmul.f32 %v508_v49, %v440_v58 }
 0x2b4   :  { %v458_v60 = vadd.f32 %v509_v52, %v449_v59 }
 0x2b6   :  { %460 = vst [vmem:[#allocation10 + $0x8] sm:$0xff] %v458_v60 }
 0x2b7   :  { %724 = shalt.err (!%p721_p10)
}
 0x2b8   :  { %s750_s8 = smov 128   ;;  %s751_s15 = smov 8  }
 0x2b9   :  { %472 = dma.vmem_to_hbm [thread:$0]  %s467_s6, 256, %s883_s9, [#allocation4], %s750_s8, %s750_s8, %s751_s15  }
 0x2ba   :  { %739 = dma.done.wait [#allocation4], 256  }
 0x2bb   :  { %740 = vsyncadd [#allocation4], 4294967040 }
 0x2bc   :  { %476 = vsyncpa [#allocation3], 1 }
 0x2bd   :  { %477 = vsyncpa [#allocation6], 1 }
 0x2be   :  { %478 = vsyncpa [#allocation9], 1 }
 0x2bf   :  { %479 = vsyncpa [#allocation4], 1 }

</bundles_post_ra>
